<compile_context>
chip_gen: v7x
topology: tpu7x:2x2x1
jax: 0.10.0
libtpu: 0.0.40
codegen_flags: <defaults>
</compile_context>

<pallas_src>
import functools

import jax
import jax.numpy as jnp
from jax.experimental import pallas as pl
from jax.experimental.pallas import tpu as pltpu


def _cdiv(a, b):
    return -(-a // b)


def _round_up(a, b):
    return _cdiv(a, b) * b


# ---------------------------------------------------------------------------
# Shared: fused avg/max -> 2-layer MLP -> sigmoid gate on (C, 1) statistics.
# ---------------------------------------------------------------------------
def _gate_from_stats(avg, mx, w1_ref, w2_ref):
    # Stack avg & max as the two columns of a (C, 2) operand (broadcast +
    # select; avoids a lane concat).  One pair of tiny matmuls covers both
    # branches; ReLU is per column and the two outputs are summed afterwards,
    # matching fc2(relu(fc1(avg))) + fc2(relu(fc1(max))) exactly.
    col = jax.lax.broadcasted_iota(jnp.int32, (avg.shape[0], 2), 1)
    pooled = jnp.where(col == 0, avg, mx)                        # (C, 2)
    h = jnp.dot(w1_ref[...], pooled,
                preferred_element_type=jnp.float32)              # (Cr, 2)
    h = jnp.maximum(h, 0.0)                                      # ReLU
    y = jnp.dot(w2_ref[...], h,
                preferred_element_type=jnp.float32)              # (C, 2)
    return jax.nn.sigmoid(jnp.sum(y, axis=-1, keepdims=True))    # (C, 1)


# ---------------------------------------------------------------------------
# Fused single-pass kernel: whole (C, S) sample per grid step.
# ---------------------------------------------------------------------------
def _fused_kernel(w1_ref, w2_ref, x_ref, o_ref, *, s_true):
    x = x_ref[0].astype(jnp.float32)                             # (C, S)
    avg = jnp.sum(x, axis=-1, keepdims=True) * (1.0 / float(s_true))
    mx = jnp.max(x, axis=-1, keepdims=True)
    gate = _gate_from_stats(avg, mx, w1_ref, w2_ref)             # (C, 1)
    o_ref[0] = (gate * x).astype(o_ref.dtype)


# ---------------------------------------------------------------------------
# Tiled fallback, Phase A: accumulate per-channel sum/max over S tiles,
# emit the (C, 1) gate on the last tile.  Input is NOT padded.
# ---------------------------------------------------------------------------
def _pool_gate_kernel(w1_ref, w2_ref, x_ref, gate_ref, sum_acc, max_acc, *,
                      s_true, ts):
    t = pl.program_id(1)
    n_t = pl.num_programs(1)

    @pl.when(t == 0)
    def _():
        sum_acc[...] = jnp.zeros_like(sum_acc)
        max_acc[...] = jnp.full_like(max_acc, -jnp.inf)

    x = x_ref[0].astype(jnp.float32)                             # (C, TS)
    rem = s_true % ts                                            # static

    def _accum(x_sum, x_max):
        sum_acc[...] += jnp.sum(x_sum, axis=-1, keepdims=True)
        max_acc[...] = jnp.maximum(max_acc[...],
                                   jnp.max(x_max, axis=-1, keepdims=True))

    if rem == 0:
        # Every tile fully valid: no mask work at all (static decision).
        _accum(x, x)
    else:
        # Only the last tile is partial; its tail lanes hold undefined data
        # (no host-side zero padding), so mask BOTH the sum and the max.
        @pl.when(t < n_t - 1)
        def _():
            _accum(x, x)

        @pl.when(t == n_t - 1)
        def _():
            valid = jax.lax.broadcasted_iota(jnp.int32, (1, ts), 1) < rem
            _accum(jnp.where(valid, x, 0.0), jnp.where(valid, x, -jnp.inf))

    @pl.when(t == n_t - 1)
    def _():
        avg = sum_acc[...] * (1.0 / float(s_true))               # (C, 1)
        gate = _gate_from_stats(avg, max_acc[...], w1_ref, w2_ref)
        gate_ref[0] = gate.astype(gate_ref.dtype)


# ---------------------------------------------------------------------------
# Tiled fallback, Phase B: broadcast the (C, 1) gate over the S tile.
# ---------------------------------------------------------------------------
def _scale_kernel(gate_ref, x_ref, o_ref):
    o_ref[0] = (gate_ref[0] * x_ref[0]).astype(o_ref.dtype)


def channel_attention_forward(x, w1, w2, *,
                              tile_bytes=4 * 1024 * 1024,
                              fused_budget_bytes=32 * 1024 * 1024,
                              vmem_limit_bytes=48 * 1024 * 1024):
    """x: (N, C, D, H, W); w1: (C//r, C); w2: (C, C//r). Returns x.shape."""
    N, C, D, H, W = x.shape
    S = D * H * W
    Cr = w1.shape[0]
    itemsize = x.dtype.itemsize

    x_flat = x.reshape(N, C, S)

    # ---- Fused single-pass path (1 HBM read + 1 write of x) --------------
    # Budget: input + output double-buffered (4 * slab) plus an f32 working
    # copy of the slab; 32 MiB keeps us well inside every generation's VMEM
    # with vmem_limit_bytes = 48 MiB (v7x physical is 64 MiB).
    fused_bytes = C * S * (4 * itemsize + 4)
    if fused_bytes <= fused_budget_bytes:
        out = pl.pallas_call(
            functools.partial(_fused_kernel, s_true=S),
            out_shape=jax.ShapeDtypeStruct((N, C, S), x.dtype),
            grid_spec=pltpu.PrefetchScalarGridSpec(
                num_scalar_prefetch=0,
                grid=(N,),
                in_specs=[
                    pl.BlockSpec((Cr, C), lambda n: (0, 0)),
                    pl.BlockSpec((C, Cr), lambda n: (0, 0)),
                    pl.BlockSpec((1, C, S), lambda n: (n, 0, 0)),
                ],
                out_specs=pl.BlockSpec((1, C, S), lambda n: (n, 0, 0)),
            ),
            compiler_params=pltpu.CompilerParams(
                dimension_semantics=("parallel",),
                vmem_limit_bytes=vmem_limit_bytes),
        )(w1, w2, x_flat)
        return out.reshape(N, C, D, H, W)

    # ---- Tiled two-phase fallback for large volumes -----------------------
    # Lane-dense S tiling: TS is a multiple of 128, ~tile_bytes per tile,
    # sized from the actual input itemsize.  No host-side padding: the last
    # tile may be partial (reads masked in-kernel, OOB writes discarded).
    lane_target = max(128, (tile_bytes // (itemsize * C)) // 128 * 128)
    s_128 = _round_up(S, 128)
    if s_128 <= lane_target:
        T, TS = 1, s_128
    else:
        T = _cdiv(S, lane_target)
        TS = _round_up(_cdiv(S, T), 128)

    # Phase A: pooled stats + fused MLP -> per-sample channel gate.
    gate = pl.pallas_call(
        functools.partial(_pool_gate_kernel, s_true=S, ts=TS),
        out_shape=jax.ShapeDtypeStruct((N, C, 1), jnp.float32),
        grid_spec=pltpu.PrefetchScalarGridSpec(
            num_scalar_prefetch=0,
            grid=(N, T),
            in_specs=[
                # Tiny weights: constant block index -> fetched once.
                pl.BlockSpec((Cr, C), lambda n, t: (0, 0)),
                pl.BlockSpec((C, Cr), lambda n, t: (0, 0)),
                pl.BlockSpec((1, C, TS), lambda n, t: (n, 0, t)),
            ],
            out_specs=pl.BlockSpec((1, C, 1), lambda n, t: (n, 0, 0)),
            scratch_shapes=[pltpu.VMEM((C, 1), jnp.float32),
                            pltpu.VMEM((C, 1), jnp.float32)],
        ),
        compiler_params=pltpu.CompilerParams(
            dimension_semantics=("parallel", "arbitrary"),
            vmem_limit_bytes=vmem_limit_bytes),
    )(w1, w2, x_flat)

    # Phase B: stream x again, write gate * x lane-dense.
    out = pl.pallas_call(
        _scale_kernel,
        out_shape=jax.ShapeDtypeStruct((N, C, S), x.dtype),
        grid_spec=pltpu.PrefetchScalarGridSpec(
            num_scalar_prefetch=0,
            grid=(N, T),
            in_specs=[
                pl.BlockSpec((1, C, 1), lambda n, t: (n, 0, 0)),
                pl.BlockSpec((1, C, TS), lambda n, t: (n, 0, t)),
            ],
            out_specs=pl.BlockSpec((1, C, TS), lambda n, t: (n, 0, t)),
        ),
        compiler_params=pltpu.CompilerParams(
            dimension_semantics=("parallel", "parallel"),
            vmem_limit_bytes=vmem_limit_bytes),
    )(gate, x_flat)

    return out.reshape(N, C, D, H, W)


def channel_attention_reference(x, w1, w2):
    # Pure-JAX reference of the PyTorch forward.
    avg = jnp.mean(x, axis=(2, 3, 4), keepdims=True)   # (N, C, 1, 1, 1)
    mx = jnp.max(x, axis=(2, 3, 4), keepdims=True)

    def mlp(p):
        h = jnp.einsum('rc,ncxyz->nrxyz', w1, p)
        h = jnp.maximum(h, 0.0)
        return jnp.einsum('cr,nrxyz->ncxyz', w2, h)

    return jax.nn.sigmoid(mlp(avg) + mlp(mx)) * x


if __name__ == "__main__":
    key = jax.random.PRNGKey(0)
    k_x1, k_x2, k_w1, k_w2 = jax.random.split(key, 4)

    C, ratio = 16, 8
    Cr = C // ratio

    # Deterministic synthetic weights (kaiming-ish scale for 1x1x1 convs).
    w1 = jax.random.normal(k_w1, (Cr, C), dtype=jnp.float32) * (2.0 / C) ** 0.5
    w2 = jax.random.normal(k_w2, (C, Cr), dtype=jnp.float32) * (2.0 / Cr) ** 0.5

    # Case 1: small sample -> fused single-pass path (1 HBM read of x).
    x1 = jax.random.normal(k_x1, (2, C, 4, 8, 8), dtype=jnp.float32)
    out1 = jax.block_until_ready(channel_attention_forward(x1, w1, w2))
    ref1 = channel_attention_reference(x1, w1, w2)
    assert out1.shape == x1.shape
    assert jnp.allclose(out1, ref1, atol=1e-5, rtol=1e-5), "mismatch (fused)"

    # Case 2: force the tiled two-phase path with a ragged S (315 -> three
    # 128-wide tiles, last one partial) to exercise the multi-tile
    # accumulation, the last-tile mask, and the partial output block.
    x2 = jax.random.normal(k_x2, (1, C, 5, 7, 9), dtype=jnp.float32)
    out2 = jax.block_until_ready(
        channel_attention_forward(x2, w1, w2,
                                  tile_bytes=C * 128 * 4,
                                  fused_budget_bytes=0))
    ref2 = channel_attention_reference(x2, w1, w2)
    assert out2.shape == x2.shape
    assert jnp.allclose(out2, ref2, atol=1e-5, rtol=1e-5), "mismatch (tiled)"

    print("KERNEL_OK")
</pallas_src>

<mosaic_0001>
module attributes {stable_mosaic.version = 11 : i64} {
  func.func @_fused_kernel(%arg0: i32, %arg1: memref<2x16xf32, #tpu.memory_space<vmem>>, %arg2: memref<16x2xf32, #tpu.memory_space<vmem>>, %arg3: memref<1x16x256xf32, #tpu.memory_space<vmem>>, %arg4: memref<1x16x256xf32, #tpu.memory_space<vmem>>) attributes {dimension_semantics = [#tpu.dimension_semantics<parallel>], iteration_bounds = array<i64: 2>, scalar_prefetch = 0 : i64, scratch_operands = 0 : i64, tpu.core_type = #tpu.core_type<tc>, window_params = [{pipeline_mode = #tpu.pipeline_mode<synchronous>, transform_indices = @transform_0, window_bounds = array<i64: 2, 16>}, {pipeline_mode = #tpu.pipeline_mode<synchronous>, transform_indices = @transform_1, window_bounds = array<i64: 16, 2>}, {transform_indices = @transform_2, window_bounds = array<i64: 1, 16, 256>}, {transform_indices = @transform_3, window_bounds = array<i64: 1, 16, 256>}]} {
    %c0 = arith.constant 0 : index
    %c0_0 = arith.constant 0 : index
    %c0_1 = arith.constant 0 : index
    %0 = vector.load %arg3[%c0, %c0_0, %c0_1] : memref<1x16x256xf32, #tpu.memory_space<vmem>>, vector<1x16x256xf32>
    %1 = vector.shape_cast %0 : vector<1x16x256xf32> to vector<16x256xf32>
    %cst = arith.constant dense<0.000000e+00> : vector<16xf32>
    %2 = vector.multi_reduction <add>, %1, %cst [1] : vector<16x256xf32> to vector<16xf32>
    %3 = vector.shape_cast %2 : vector<16xf32> to vector<16x1xf32>
    %cst_2 = arith.constant 3.906250e-03 : f32
    %4 = vector.broadcast %cst_2 : f32 to vector<16x1xf32>
    %5 = arith.mulf %3, %4 : vector<16x1xf32>
    %cst_3 = arith.constant dense<0xFF800000> : vector<16xf32>
    %6 = vector.multi_reduction <maximumf>, %1, %cst_3 [1] : vector<16x256xf32> to vector<16xf32>
    %7 = vector.shape_cast %6 : vector<16xf32> to vector<16x1xf32>
    %8 = tpu.iota {dimensions = array<i32: 1>} : vector<16x2xi32>
    %c0_i32 = arith.constant 0 : i32
    %9 = vector.broadcast %c0_i32 : i32 to vector<16x2xi32>
    %10 = arith.cmpi eq, %8, %9 : vector<16x2xi32>
    %11 = vector.shape_cast %5 : vector<16x1xf32> to vector<16x1xf32>
    %12 = vector.broadcast %11 : vector<16x1xf32> to vector<16x2xf32>
    %13 = vector.shape_cast %7 : vector<16x1xf32> to vector<16x1xf32>
    %14 = vector.broadcast %13 : vector<16x1xf32> to vector<16x2xf32>
    %15 = arith.select %10, %12, %14 : vector<16x2xi1>, vector<16x2xf32>
    %c0_4 = arith.constant 0 : index
    %c0_5 = arith.constant 0 : index
    %16 = vector.load %arg1[%c0_4, %c0_5] : memref<2x16xf32, #tpu.memory_space<vmem>>, vector<2x16xf32>
    %cst_6 = arith.constant dense<0.000000e+00> : vector<2x2xf32>
    %17 = tpu.matmul %16, %15, %cst_6 {dimension_numbers = #tpu.dot_dimension_numbers<[1], [0], [0], [1], [0, 0, 1, 1], [], []>} : vector<2x16xf32>, vector<16x2xf32>, vector<2x2xf32> -> vector<2x2xf32>
    %cst_7 = arith.constant 0.000000e+00 : f32
    %18 = vector.broadcast %cst_7 : f32 to vector<2x2xf32>
    %19 = arith.maximumf %17, %18 : vector<2x2xf32>
    %c0_8 = arith.constant 0 : index
    %c0_9 = arith.constant 0 : index
    %20 = vector.load %arg2[%c0_8, %c0_9] : memref<16x2xf32, #tpu.memory_space<vmem>>, vector<16x2xf32>
    %cst_10 = arith.constant dense<0.000000e+00> : vector<16x2xf32>
    %21 = tpu.matmul %20, %19, %cst_10 {dimension_numbers = #tpu.dot_dimension_numbers<[1], [0], [0], [1], [0, 0, 1, 1], [], []>} : vector<16x2xf32>, vector<2x2xf32>, vector<16x2xf32> -> vector<16x2xf32>
    %cst_11 = arith.constant dense<0.000000e+00> : vector<16xf32>
    %22 = vector.multi_reduction <add>, %21, %cst_11 [1] : vector<16x2xf32> to vector<16xf32>
    %23 = vector.shape_cast %22 : vector<16xf32> to vector<16x1xf32>
    %24 = arith.negf %23 : vector<16x1xf32>
    %25 = math.exp %24 : vector<16x1xf32>
    %cst_12 = arith.constant 1.000000e+00 : f32
    %26 = vector.broadcast %cst_12 : f32 to vector<16x1xf32>
    %27 = arith.addf %26, %25 : vector<16x1xf32>
    %28 = arith.divf %26, %27 : vector<16x1xf32>
    %29 = vector.broadcast %28 : vector<16x1xf32> to vector<16x256xf32>
    %30 = arith.mulf %29, %1 : vector<16x256xf32>
    %c0_13 = arith.constant 0 : index
    %c0_14 = arith.constant 0 : index
    %c0_15 = arith.constant 0 : index
    %31 = vector.load %arg4[%c0_13, %c0_14, %c0_15] : memref<1x16x256xf32, #tpu.memory_space<vmem>>, vector<1x16x256xf32>
    %32 = vector.shape_cast %31 : vector<1x16x256xf32> to vector<16x256xf32>
    %33 = vector.shape_cast %30 : vector<16x256xf32> to vector<1x16x256xf32>
    tpu.vector_store %arg4[%c0_13, %c0_14, %c0_15], %33 {strides = array<i32>} : memref<1x16x256xf32, #tpu.memory_space<vmem>>, vector<1x16x256xf32>,
    return
  }
  func.func @transform_0(%arg0: i32) -> (i32, i32) {
    %c0_i32 = arith.constant 0 : i32
    %c0_i32_0 = arith.constant 0 : i32
    %c0_i32_1 = arith.constant 0 : i32
    return %c0_i32, %c0_i32_0 : i32, i32
  }
  func.func @transform_1(%arg0: i32) -> (i32, i32) {
    %c0_i32 = arith.constant 0 : i32
    %c0_i32_0 = arith.constant 0 : i32
    %c0_i32_1 = arith.constant 0 : i32
    return %c0_i32, %c0_i32_0 : i32, i32
  }
  func.func @transform_2(%arg0: i32) -> (i32, i32, i32) {
    %c0_i32 = arith.constant 0 : i32
    %c0_i32_0 = arith.constant 0 : i32
    %c0_i32_1 = arith.constant 0 : i32
    return %arg0, %c0_i32, %c0_i32_0 : i32, i32, i32
  }
  func.func @transform_3(%arg0: i32) -> (i32, i32, i32) {
    %c0_i32 = arith.constant 0 : i32
    %c0_i32_0 = arith.constant 0 : i32
    %c0_i32_1 = arith.constant 0 : i32
    return %arg0, %c0_i32, %c0_i32_0 : i32, i32, i32
  }
}

</mosaic_0001>

<bundles_post_ra>
// kernel: tpu_custom_call.1
= control target key start
LH: loop header
LB: loop body
LE: loop exit
PB: predicated region body
PF: predicated region fallthrough
CT: control target
= control target key end

     0   :  { %8 = vsyncpa [#allocation3], 0  ;;  %s915_s0 = inlined_call_operand.vmem [shape: f32[2,16], index: 0, kind: input, shape index: {}]   ;;  %s916_s1 = inlined_call_operand.vmem [shape: f32[16,2], index: 1, kind: input, shape index: {}]   ;;  %s917_s2 = inlined_call_operand.hbm [shape: f32[2,16,256], index: 2, kind: input, shape index: {}]   ;;  %s918_s3 = inlined_call_operand.hbm [shape: f32[2,16,256], index: 3, kind: output, shape index: {}]  }
   0x1   :  { %10 = vsyncpa [#allocation3 + $0x1], 0 }
   0x2   :  { %11 = vsyncpa [#allocation4], 0 }
   0x3   :  { %13 = vsyncpa [#allocation4 + $0x1], 0  ;;  %s720_s12 = smov 0   ;;  %s722_s13 = smov 0  }
   0x4   :  { %s724_s14 = smov 0   ;;  %s726_s15 = smov 0  }
   0x5 LB: > { %s741_s16 = sadd.s32 4294967295, %s689_s15   ;;  %s489_s17 = sadd.s32 4294967294, %s689_s15   ;;  %s689_s15 = sphi %s726_s15, %s931_s15   ;;  %s685_s14 = sphi %s724_s14, %s930_s14   ;;  %s681_s13 = sphi %s722_s13, %s929_s13   ;;  %s677_s12 = sphi %s720_s12, %s928_s12  }
   0x6   : > { %s745_s18 = sadd.s32 1, %s689_s15   ;;  %s68_s19 = sadd.s32 1, %s685_s14 }
   0x7   : > { %s65_s20 = ssub.s32 %s689_s15, %s745_s18  ;;  %p75_p0 = scmp.ne.s32.totalorder %s685_s14, %s681_s13 }
   0x8   : > { %p66_p1 = scmp.eq.s32.totalorder %s65_s20, 0  ;;  %p76_p2 = scmp.eq.s32.totalorder %s689_s15, 0 }
   0x9   : > { %p81_p3 = scmp.ne.s32.totalorder %s681_s13, %s677_s12  ;;  %p82_p4 = scmp.eq.s32.totalorder %s741_s16, 0 }
   0xa   : > { %s757_s21 = scalar_select %p66_p1, %s685_s14, %s68_s19  }
   0xb   : > { %p759_p5 = por %p76_p2, %p75_p0  ;;  %p763_p6 = por %p82_p4, %p81_p3 }
   0xc   : > { %p105_p7 = scmp.eq.s32.totalorder %s741_s16, 1  ;;  %p111_p8 = scmp.eq.s32.totalorder %s489_s17, 1 }
   0xd   : > { %p544_p10 = scmp.lt.s32.totalorder %s689_s15, 2  ;;  %s137_s26 = sand.u32 1, %s685_s14  }
   0xe   : > { %p770_p11 = por %p105_p7, %p75_p0  ;;  %p774_p12 = por %p111_p8, %p81_p3 }
   0xf   : > { %s509_s27 = sshll.u32 %s689_s15, 9  ;;  %s492_s28 = sshll.u32 %s137_s26, 5 }
  0x10   : > { %s922_s24 = scalar_select %p770_p11, 1, 0 }
  0x11   : > { %s923_s25 = scalar_select %p774_p12, 1, 0 }
  0x12   : > { %s783_s4 = scalar_lea.hbm %s917_s2, %s509_s27  ;;  %s141_s5 = scalar_lea.vmem [#allocation2], %s492_s28 }
  0x13   : > { %s148_s6 = sshll.u32 %s141_s5, 4  ;;  %p787_p13 = pnand %p544_p10, %p759_p5  ;;  %s791_s6 = int_to_ptr.vmem [resolvable:$true] %s148_s6 }
  0x14   : > { %s793_s8 = scalar_lea.sflag [#allocation3], %s137_s26  ;;  %s593_s9 = scalar_lea.hbm %s783_s4, 512 }
  0x15   : > { %p594_p0 = scmp.ne.s32.totalorder %s783_s4, %s593_s9  ;;  %p595_p1 = pneg %p787_p13 }
  0x16   : > { %s598_s17 = scalar_lea.hbm %s917_s2, 1024  ;;  %p599_p4 = scmp.lt.u32.totalorder %s783_s4, %s917_s2 }
  0x17   : > { %p596_p2 = pnand %p595_p1, %p594_p0  ;;  %p600_p5 = scmp.lt.u32.totalorder %s598_s17, %s593_s9 }
  0x18   : > { %p602_p8 = scmp.lt.u32.totalorder %s593_s9, %s783_s4 }
  0x19   : > { %p597_p3 = pneg %p596_p2  ;;  %p601_p7 = por %p600_p5, %p599_p4 }
  0x1b   : > { %p603_p10 = por %p602_p8, %p601_p7 }
  0x1d   : > { %p604_p9 = pnand %p603_p10, %p597_p3 }
  0x1f   : > { %607 = shalt.err (!%p604_p9)
}
  0x20   : > { %s608_s22 = scalar_lea.vmem %s791_s6, 512  ;;  %s691_s26 = smov [#allocation2]  }
  0x21   : > { %p609_p0 = scmp.ne.s32.totalorder %s791_s6, %s608_s22  ;;  %s613_s27 = sshll.u32 %s691_s26, 4  ;;  %s614_s27 = int_to_ptr.vmem [resolvable:$false] %s613_s27 }
  0x22   : > { %s615_s28 = scalar_lea.vmem %s614_s27, 1024  ;;  %p616_p11 = scmp.lt.s32.totalorder %s791_s6, %s614_s27 }
  0x23   : > { %p611_p2 = pnand %p609_p0, %p595_p1  ;;  %p617_p4 = scmp.lt.s32.totalorder %s615_s28, %s608_s22 }
  0x25   : > { %p612_p12 = pneg %p611_p2  ;;  %p618_p5 = por %p617_p4, %p616_p11 }
  0x27   : > { %p619_p7 = pnand %p618_p5, %p612_p12 }
  0x29   : > { %622 = shalt.err (!%p619_p7)
}
  0x2a   : > { %s692_s29 = smov 256   ;;  %s693_s30 = smov 16  }
  0x2b   : > { %539 = dma.hbm_to_vmem [thread:$0]  (!%p787_p13), %s783_s4, 512, %s791_s6, %s793_s8, %s692_s29, %s692_s29, %s693_s30  }
  0x2c   : > { %p495_p9 = scmp.ge.s32.totalorder %s689_s15, 1  ;;  %p156_p1 = scmp.lt.s32.totalorder %s689_s15, 3 }
  0x2e   : > { %p157_p3 = pnand %p495_p9, %p156_p1 }
  0x2f   : > { %s824_s5 = sand.u32 (!%p157_p3), 1, %s681_s13  }
  0x30   : > { %160 = sbr.rel (%p157_p3) target bundleno = 828 (0x33c), region = 32  ;;  %s496_s9 = sshll.u32 (!%p157_p3), %s824_s5, 5 }
  0x31   : > { %s163_s10 = scalar_lea.sflag (!%p157_p3), [#allocation3], %s824_s5  ;;  %s166_s11 = scalar_lea.vmem (!%p157_p3), [#allocation2], %s496_s9 }
  0x37   : > { %668 = dma.done.wait (%p763_p6), %s163_s10, 512  }
  0x38   : > { %670 = vsyncadd (%p763_p6), %s163_s10, 4294966784  ;;  %v834_v0 = vld [vmem:[%s166_s11] sm:$0xff]  ;;  %v836_v1 = vld [vmem:[%s166_s11 + $0x8] sm:$0xff]  ;;  %v694_v8 = vmov 0.0|0.0   ;;  %vm695_vm0 = vmmov 0   ;;  %v696_v9 = vmov 0.0   ;;  %v207_v10 = vlaneseq }
  0x39   : > { %v838_v2 = vld [vmem:[%s166_s11 + $0x10] sm:$0xff]  ;;  %v193_v3 = vadd.f32 %v836_v1, %v834_v0  ;;  %v201_v4 = vmax.f32 %v834_v0, %v836_v1  ;;  %v844_v5 = vld [vmem:[%s166_s11 + $0x18] sm:$0xff]  ;;  %529 = vmatprep.subr.bf16.mxu0 %v694_v8  ;;  %521 = vmatprep.mubr.msk.f32.mxu0 %vm695_vm0, %v696_v9  ;;  %v212_v21 = vld [vmem:[%s915_s0] sm:$0x3]  ;;  %vm213_vm2 = vcmask 130048   ;;  %vm290_vm3 = vcmask 15360  }
  0x3a   : > { %v196_v6 = vadd.f32 %v844_v5, %v838_v2  ;;  %v204_v7 = vmax.f32 %v838_v2, %v844_v5  ;;  %v208_v12 = vand.u32 127, %v207_v10  ;;  %v288_v22 = vld [vmem:[%s916_s1] sm:$0xff]  ;;  %vm297_vm4 = vcmask 1041408   ;;  %v289_v26 = vld [vmem:[%s916_s1 + $0x8] sm:$0xff]  ;;  %s510_s19 = sshll.u32 %s741_s16, 9  ;;  %s188_s20 = scalar_lea.vmem [#allocation5], %s496_s9 }
  0x3b   : > { %194 = vadd.xlane.f32.xlu0 %v193_v3  ;;  %202 = vmax.xlane.f32.xlu1 %v201_v4  ;;  %s416_s22 = sshll.u32 %s188_s20, 4  ;;  %s867_s28 = scalar_lea.hbm %s918_s3, %s510_s19  ;;  %s869_s22 = int_to_ptr.vmem [resolvable:$true] %s416_s22 }
  0x3c   : > { %vm209_vm1 = vcmp.eq.s32.totalorder %v208_v12, 0  ;;  %526 = vmatprep.mubr.msk.f32.mxu1 %vm290_vm3, %v288_v22  ;;  %s403_s16 = scalar_lea.sflag [#allocation4], %s824_s5  ;;  %s623_s29 = scalar_lea.vmem %s869_s22, 512 }
  0x3d   : > { %p624_p6 = scmp.ne.s32.totalorder %s869_s22, %s623_s29  ;;  %p925_p11 = scmp.ne.s32.totalorder %s922_s24, 0 }
  0x3e   : > { %s697_s30 = smov [#allocation5]  }
  0x3f   : > { %197 = vadd.xlane.f32.xlu0 %v196_v6  ;;  %205 = vmax.xlane.f32.xlu1 %v204_v7  ;;  %p625_p12 = pnand %p624_p6, %p925_p11  ;;  %s627_s9 = sshll.u32 %s697_s30, 4  ;;  %s628_s9 = int_to_ptr.vmem [resolvable:$false] %s627_s9 }
  0x40   : > { %s629_s10 = scalar_lea.vmem %s628_s9, 1024  ;;  %p630_p8 = scmp.lt.s32.totalorder %s869_s22, %s628_s9 }
  0x41   : > { %p626_p13 = pneg %p625_p12  ;;  %p631_p10 = scmp.lt.s32.totalorder %s629_s10, %s623_s29 }
  0x43   : > { %p632_p0 = por %p631_p10, %p630_p8 }
  0x45   : > { %p633_p2 = pnand %p632_p0, %p626_p13 }
  0xc8   : > { %v195_v11 = vpop.xlane.xlu0 %194  ;;  %v203_v13 = vpop.xlane.xlu1 %202 }
  0xc9   : > { %v199_v14 = vmul.f32 0.00390625, %v195_v11 }
  0xcb   : > { %v210_v18 = vsel %vm209_vm1, %v199_v14, %v203_v13 }
  0xcc   : > { %v198_v15 = vpop.xlane.xlu0 %197  ;;  %v206_v16 = vpop.xlane.xlu1 %205 }
  0xcd   : > { %v200_v17 = vmul.f32 0.00390625, %v198_v15 }
  0xcf   : > { %v211_v19 = vsel %vm209_vm1, %v200_v17, %v206_v16 }
  0xd0   : > { %v530_v20 = vpack.c.bf16 %v211_v19, %v210_v18 }
  0xd2   : > { %531 = vmatpush3.bf16.msra.mxu0 %v530_v20 }
  0xd5   : > { %522 = vmatmul.mubr.msk.f32.vlgmr.msra.gmra.mrb[0].mxu0 %vm213_vm2, %v212_v21 }
 0x1a8   : > { %v283_v23 = vpop.f32.mrb[0].mxu0 }
 0x1a9   : > { %v287_v24 = vmax.f32 %v283_v23, 0.0  ;;  %v523_v25 = vpop.f32.mrb[1].mxu0 }
 0x1ab   : > { %524 = vmatprep.subr.msk.mxu1 %vm297_vm4, %v287_v24 }
 0x1ac   : > { %525 = vmatpush3.msk.msra.mxu1 %vm297_vm4, %v287_v24 }
 0x1ad   : > { %527 = vmatmul.mubr.msk.f32.vlgmr.msra.gmra.mrb[0].mxu1 %vm290_vm3, %v289_v26 }
 0x280   : > { %v528_v27 = vpop.f32.mrb[0].mxu1 }
 0x281   : > { %v367_v28 = vpop.f32.mrb[1].mxu1  ;;  %v379_v29 = vsel %vm290_vm3, %v528_v27, 0.0 }
 0x282   : > { %380 = vadd.xlane.f32.xlu1 %v379_v29  ;;  %v376_v30 = vsel %vm290_vm3, %v367_v28, 0.0 }
 0x283   : > { %377 = vadd.xlane.f32.xlu0 %v376_v30 }
 0x30f   : > { %v381_v31 = vpop.xlane.xlu1 %380 }
 0x310   : > { %v503_v32 = vmul.f32 -1.442695, %v381_v31  ;;  %v378_v33 = vpop.xlane.xlu0 %377 }
 0x311   : > { %v502_v34 = vmul.f32 -1.442695, %v378_v33 }
 0x312   : > { %585 = vpow2.f32 %v503_v32 }
 0x313   : > { %587 = vpow2.f32 %v502_v34 }
 0x31c   : > { %v586_v35 = vpop.eup %585 }
 0x31d   : > { %v588_v36 = vpop.eup %587  ;;  %v389_v37 = vadd.f32 1.0, %v586_v35 }
 0x31e   : > { %v388_v38 = vadd.f32 1.0, %v588_v36 }
 0x31f   : > { %589 = vrcp.f32 %v389_v37 }
 0x320   : > { %591 = vrcp.f32 %v388_v38 }
 0x329   : > { %v590_v39 = vpop.eup %589 }
 0x32a   : > { %v592_v40 = vpop.eup %591  ;;  %v396_v41 = vmul.f32 %v590_v39, %v838_v2  ;;  %v397_v42 = vmul.f32 %v590_v39, %v844_v5 }
 0x32b   : > { %v394_v43 = vmul.f32 %v592_v40, %v834_v0  ;;  %v395_v44 = vmul.f32 %v592_v40, %v836_v1 }
 0x32c   : > { %400 = vst [vmem:[%s188_s20 + $0x10] sm:$0xff] %v396_v41  ;;  %401 = vst [vmem:[%s188_s20 + $0x18] sm:$0xff] %v397_v42 }
 0x32d   : > { %398 = vst [vmem:[%s188_s20] sm:$0xff] %v394_v43  ;;  %399 = vst [vmem:[%s188_s20 + $0x8] sm:$0xff] %v395_v44 }
 0x32e   : > { %636 = shalt.err (!%p633_p2)
}
 0x32f   : > { %s637_s11 = scalar_lea.hbm %s867_s28, 512  ;;  %s641_s6 = scalar_lea.hbm %s918_s3, 1024 }
 0x330   : > { %p638_p4 = scmp.ne.s32.totalorder %s867_s28, %s637_s11  ;;  %p642_p9 = scmp.lt.u32.totalorder %s867_s28, %s918_s3 }
 0x331   : > { %p643_p1 = scmp.lt.u32.totalorder %s641_s6, %s637_s11  ;;  %p645_p6 = scmp.lt.u32.totalorder %s637_s11, %s867_s28 }
 0x332   : > { %p639_p5 = pnand %p638_p4, %p925_p11 }
 0x333   : > { %p644_p3 = por %p643_p1, %p642_p9 }
 0x334   : > { %p640_p7 = pneg %p639_p5 }
 0x335   : > { %p646_p12 = por %p645_p6, %p644_p3 }
 0x337   : > { %p647_p13 = pnand %p646_p12, %p640_p7 }
 0x339   : > { %650 = shalt.err (!%p647_p13)
}
 0x33a   : > { %s698_s17 = smov 256   ;;  %s699_s19 = smov 16  }
 0x33b   : > { %534 = dma.vmem_to_hbm [thread:$0]  (%p925_p11), %s869_s22, 512, %s867_s28, %s403_s16, %s698_s17, %s698_s17, %s699_s19  }
 0x33c PF: > { %s431_s20 = sand.u32 1, %s677_s12   ;;  %p926_p8 = scmp.ne.s32.totalorder %s923_s25, 0 }
 0x33d   : > { %p927_p10 = scmp.ge.s32.totalorder %s689_s15, 2  ;;  %s432_s26 = scalar_lea.sflag [#allocation4], %s431_s20 }
 0x33f   : > { %p541_p0 = pnand %p927_p10, %p926_p8 }
 0x341   : > { %672 = dma.done.wait (!%p541_p0), %s432_s26, 512  }
 0x342   : > { %674 = vsyncadd (!%p541_p0), %s432_s26, 4294966784  ;;  %p16_p2 = scmp.ge.s32.totalorder %s745_s18, 4   ;;  %s928_s12 = smov %s681_s13 }
 0x343   : > { %s929_s13 = smov %s685_s14  ;;  %s930_s14 = smov %s757_s21 }
 0x344   : > { %s931_s15 = smov %s745_s18  ;;  %18 = sbr.rel (!%p16_p2) target bundleno = 5 (0x5), region = 77 }
 0x34b   :  { %437 = vsyncpa [#allocation3], 1 }
 0x34c   :  { %439 = vsyncpa [#allocation3 + $0x1], 1 }
 0x34d   :  { %440 = vsyncpa [#allocation4], 1 }
 0x34e   :  { %442 = vsyncpa [#allocation4 + $0x1], 1 }

</bundles_post_ra>
